<compile_context>
chip_gen: v7x
topology: tpu7x:2x2x1
jax: 0.10.0
libtpu: 0.0.40
codegen_flags: <defaults>
</compile_context>

<pallas_src>
import jax
import jax.numpy as jnp
from jax.experimental import pallas as pl
from jax.experimental.pallas import tpu as pltpu

LN_EPS = 1e-5


def _round_up(v, m):
    return (v + m - 1) // m * m


def _pad_to(a, rows, cols):
    pr, pc = rows - a.shape[0], cols - a.shape[1]
    if pr == 0 and pc == 0:
        return a
    return jnp.pad(a, ((0, pr), (0, pc)))


def _layernorm(h, gamma, beta):
    # One-pass variance: var = E[h^2] - E[h]^2  (f32 statistics, eps inside rsqrt
    # to match torch.nn.LayerNorm).
    mu = jnp.mean(h, axis=-1, keepdims=True)
    var = jnp.maximum(jnp.mean(h * h, axis=-1, keepdims=True) - mu * mu, 0.0)
    return (h - mu) * jax.lax.rsqrt(var + LN_EPS) * gamma + beta


def mlp_model_kernel(x_ref,
                     w1_ref, b1_ref, g1_ref, be1_ref,
                     w2_ref, b2_ref, g2_ref, be2_ref,
                     w3_ref, b3_ref,
                     o_ref,
                     h_ref):
    # Layers 1 & 2 depend only on the batch tile -> compute once per batch tile
    # (first nb_gos tile) and cache the bf16 hidden activations in VMEM scratch.
    @pl.when(pl.program_id(1) == 0)
    def _():
        x = x_ref[...]                                              # bf16 (TB, Kp)
        h = jnp.dot(x, w1_ref[...],
                    preferred_element_type=jnp.float32) + b1_ref[...]
        h = jnp.maximum(h, 0.0)
        h = _layernorm(h, g1_ref[...], be1_ref[...])                # f32

        r = jnp.dot(h.astype(jnp.bfloat16), w2_ref[...],
                    preferred_element_type=jnp.float32) + b2_ref[...]
        r = jnp.maximum(r, 0.0)
        r = _layernorm(r, g2_ref[...], be2_ref[...])

        h_ref[...] = (h + r).astype(h_ref.dtype)                    # residual, bf16

    # Final Linear(hidden -> nb_gos tile) + Sigmoid, streamed over w3 column tiles.
    logits = jnp.dot(h_ref[...], w3_ref[...],
                     preferred_element_type=jnp.float32) + b3_ref[...]
    o_ref[...] = jax.nn.sigmoid(logits).astype(o_ref.dtype)


def mlp_model_forward(x, params, *, tb=None, tn=None):
    """x: (B, input_length) float32; params: dict from init_params (f32, (in,out) weights)."""
    B, K = x.shape
    H = params["w1"].shape[1]
    N = params["w3"].shape[1]

    # --- tile sizes: lane-dense (multiples of (8, 128)) ---
    TB = _round_up(min(tb if tb is not None else 256, max(B, 8)), 8)
    tn_req = tn if tn is not None else 1024    # comfortable on v5e/v6e; fits v7x 64 MiB for H<=2560 bf16
    TN = min(_round_up(tn_req, 128), _round_up(N, 128))

    Bp = _round_up(B, TB)
    Kp = _round_up(K, 128)
    Np = _round_up(N, TN)

    # --- bf16 weight / activation streaming (zero padding preserves the math) ---
    xp = _pad_to(x, Bp, Kp).astype(jnp.bfloat16)
    w1 = _pad_to(params["w1"], Kp, H).astype(jnp.bfloat16)
    w2 = params["w2"].astype(jnp.bfloat16)
    w3 = _pad_to(params["w3"], H, Np).astype(jnp.bfloat16)
    b1, g1, be1 = params["b1"], params["g1"], params["be1"]
    b2, g2, be2 = params["b2"], params["g2"], params["be2"]
    b3 = _pad_to(params["b3"], 1, Np)

    grid = (Bp // TB, Np // TN)

    def const(shape):  # resident operand: same block for every grid step
        return pl.BlockSpec(shape, lambda i, j: (0, 0))

    in_specs = [
        pl.BlockSpec((TB, Kp), lambda i, j: (i, 0)),   # x: one block per batch tile
        const((Kp, H)), const((1, H)), const((1, H)), const((1, H)),
        const((H, H)), const((1, H)), const((1, H)), const((1, H)),
        pl.BlockSpec((H, TN), lambda i, j: (0, j)),    # w3 column stream (pipelined)
        pl.BlockSpec((1, TN), lambda i, j: (0, j)),    # b3 column stream
    ]
    out_specs = pl.BlockSpec((TB, TN), lambda i, j: (i, j))

    # Conservative VMEM budget (assume double-buffering everywhere) + headroom,
    # capped at v7x's 64 MiB physical VMEM.
    vmem_est = (2 * TB * Kp * 2 + 2 * Kp * H * 2 + 2 * H * H * 2
                + 2 * 6 * H * 4 + 2 * H * TN * 2 + 2 * TN * 4
                + 2 * TB * TN * 4 + TB * H * 2)
    vmem_limit = int(min(64 * 2**20, max(32 * 2**20, int(vmem_est * 1.5))))

    cost = pl.CostEstimate(
        flops=int(2 * Bp * (Kp * H + H * H + H * Np)),
        transcendentals=int(Bp * Np + 2 * Bp * H),
        bytes_accessed=int(xp.size * 2 + w1.size * 2 + w2.size * 2 + w3.size * 2
                           + (6 * H + Np) * 4 + Bp * Np * 4),
    )

    out = pl.pallas_call(
        mlp_model_kernel,
        out_shape=jax.ShapeDtypeStruct((Bp, Np), jnp.float32),
        grid_spec=pltpu.PrefetchScalarGridSpec(
            num_scalar_prefetch=0,
            grid=grid,
            in_specs=in_specs,
            out_specs=out_specs,
            scratch_shapes=[pltpu.VMEM((TB, H), jnp.bfloat16)],   # cached hidden acts
        ),
        compiler_params=pltpu.CompilerParams(
            dimension_semantics=("parallel", "arbitrary"),
            vmem_limit_bytes=vmem_limit,
        ),
        cost_estimate=cost,
    )(xp, w1, b1, g1, be1, w2, b2, g2, be2, w3, b3)

    return out[:B, :N]


def init_params(key, input_length, hidden, nb_gos):
    """Deterministic synthetic params (f32). Linear weights stored as (in, out)."""
    ks = jax.random.split(key, 6)

    def linear(kw, kb, fan_in, fan_out):
        bound = 1.0 / jnp.sqrt(jnp.float32(fan_in))
        w = jax.random.uniform(kw, (fan_in, fan_out), jnp.float32, -bound, bound)
        b = jax.random.uniform(kb, (1, fan_out), jnp.float32, -bound, bound)
        return w, b

    w1, b1 = linear(ks[0], ks[1], input_length, hidden)
    w2, b2 = linear(ks[2], ks[3], hidden, hidden)
    w3, b3 = linear(ks[4], ks[5], hidden, nb_gos)
    return {
        "w1": w1, "b1": b1,
        "g1": jnp.ones((1, hidden), jnp.float32), "be1": jnp.zeros((1, hidden), jnp.float32),
        "w2": w2, "b2": b2,
        "g2": jnp.ones((1, hidden), jnp.float32), "be2": jnp.zeros((1, hidden), jnp.float32),
        "w3": w3, "b3": b3,
    }


def reference_forward(x, p):
    """Pure-JAX reference for the torch eval-mode forward. Mirrors the kernel's
    bf16 weight/activation quantization (f32 accumulation) so the correctness
    check is tight and deterministic; dropout is identity in eval mode."""
    bf = lambda a: a.astype(jnp.bfloat16).astype(jnp.float32)
    h = jnp.maximum(bf(x) @ bf(p["w1"]) + p["b1"], 0.0)
    h = _layernorm(h, p["g1"], p["be1"])
    r = jnp.maximum(bf(h) @ bf(p["w2"]) + p["b2"], 0.0)
    r = _layernorm(r, p["g2"], p["be2"])
    h = bf(h + r)
    return jax.nn.sigmoid(h @ bf(p["w3"]) + p["b3"])


if __name__ == "__main__":
    # Small-but-lane-aware demo shapes; non-multiples exercise the padding path,
    # tb/tn chosen so the (batch, nb_gos) grid has multiple tiles on both axes.
    B, INPUT_LEN, HIDDEN, NB_GOS = 16, 200, 128, 300

    key = jax.random.PRNGKey(0)
    k_x, k_p = jax.random.split(key)
    x = jax.random.normal(k_x, (B, INPUT_LEN), jnp.float32)
    params = init_params(k_p, INPUT_LEN, HIDDEN, NB_GOS)

    out = jax.block_until_ready(mlp_model_forward(x, params, tb=8, tn=128))
    ref = jax.block_until_ready(reference_forward(x, params))

    assert out.shape == (B, NB_GOS)
    max_err = float(jnp.max(jnp.abs(out - ref)))
    assert jnp.allclose(out, ref, atol=5e-3, rtol=0.0), f"mismatch vs reference, max_err={max_err}"
    print("KERNEL_OK")
</pallas_src>

<mosaic_0001>
module attributes {stable_mosaic.version = 11 : i64} {
  func.func @mlp_model_kernel(%arg0: i32, %arg1: i32, %arg2: memref<8x256xbf16, #tpu.memory_space<vmem>>, %arg3: memref<256x128xbf16, #tpu.memory_space<vmem>>, %arg4: memref<1x128xf32, #tpu.memory_space<vmem>>, %arg5: memref<1x128xf32, #tpu.memory_space<vmem>>, %arg6: memref<1x128xf32, #tpu.memory_space<vmem>>, %arg7: memref<128x128xbf16, #tpu.memory_space<vmem>>, %arg8: memref<1x128xf32, #tpu.memory_space<vmem>>, %arg9: memref<1x128xf32, #tpu.memory_space<vmem>>, %arg10: memref<1x128xf32, #tpu.memory_space<vmem>>, %arg11: memref<128x128xbf16, #tpu.memory_space<vmem>>, %arg12: memref<1x128xf32, #tpu.memory_space<vmem>>, %arg13: memref<8x128xf32, #tpu.memory_space<vmem>>, %arg14: memref<8x128xbf16, #tpu.memory_space<vmem>>) attributes {dimension_semantics = [#tpu.dimension_semantics<parallel>, #tpu.dimension_semantics<arbitrary>], iteration_bounds = array<i64: 2, 3>, scalar_prefetch = 0 : i64, scratch_operands = 1 : i64, tpu.core_type = #tpu.core_type<tc>, window_params = [{transform_indices = @transform_0, window_bounds = array<i64: 8, 256>}, {pipeline_mode = #tpu.pipeline_mode<synchronous>, transform_indices = @transform_1, window_bounds = array<i64: 256, 128>}, {pipeline_mode = #tpu.pipeline_mode<synchronous>, transform_indices = @transform_2, window_bounds = array<i64: 1, 128>}, {pipeline_mode = #tpu.pipeline_mode<synchronous>, transform_indices = @transform_3, window_bounds = array<i64: 1, 128>}, {pipeline_mode = #tpu.pipeline_mode<synchronous>, transform_indices = @transform_4, window_bounds = array<i64: 1, 128>}, {pipeline_mode = #tpu.pipeline_mode<synchronous>, transform_indices = @transform_5, window_bounds = array<i64: 128, 128>}, {pipeline_mode = #tpu.pipeline_mode<synchronous>, transform_indices = @transform_6, window_bounds = array<i64: 1, 128>}, {pipeline_mode = #tpu.pipeline_mode<synchronous>, transform_indices = @transform_7, window_bounds = array<i64: 1, 128>}, {pipeline_mode = #tpu.pipeline_mode<synchronous>, transform_indices = @transform_8, window_bounds = array<i64: 1, 128>}, {transform_indices = @transform_9, window_bounds = array<i64: 128, 128>}, {transform_indices = @transform_10, window_bounds = array<i64: 1, 128>}, {transform_indices = @transform_11, window_bounds = array<i64: 8, 128>}]} {
    %c0_i32 = arith.constant 0 : i32
    %0 = arith.cmpi eq, %arg1, %c0_i32 : i32
    %1 = arith.extui %0 : i1 to i32
    %c0_i32_0 = arith.constant 0 : i32
    %2 = arith.cmpi ne, %1, %c0_i32_0 : i32
    scf.if %2 {
      %c0_9 = arith.constant 0 : index
      %c0_10 = arith.constant 0 : index
      %15 = vector.load %arg2[%c0_9, %c0_10] : memref<8x256xbf16, #tpu.memory_space<vmem>>, vector<8x256xbf16>
      %c0_11 = arith.constant 0 : index
      %c0_12 = arith.constant 0 : index
      %16 = vector.load %arg3[%c0_11, %c0_12] : memref<256x128xbf16, #tpu.memory_space<vmem>>, vector<256x128xbf16>
      %cst_13 = arith.constant dense<0.000000e+00> : vector<8x128xf32>
      %17 = tpu.matmul %15, %16, %cst_13 {dimension_numbers = #tpu.dot_dimension_numbers<[1], [0], [0], [1], [0, 0, 1, 1], [], []>} : vector<8x256xbf16>, vector<256x128xbf16>, vector<8x128xf32> -> vector<8x128xf32>
      %c0_14 = arith.constant 0 : index
      %c0_15 = arith.constant 0 : index
      %18 = vector.load %arg4[%c0_14, %c0_15] : memref<1x128xf32, #tpu.memory_space<vmem>>, vector<1x128xf32>
      %19 = vector.broadcast %18 : vector<1x128xf32> to vector<8x128xf32>
      %20 = arith.addf %17, %19 : vector<8x128xf32>
      %cst_16 = arith.constant 0.000000e+00 : f32
      %21 = vector.broadcast %cst_16 : f32 to vector<8x128xf32>
      %22 = arith.maximumf %20, %21 : vector<8x128xf32>
      %c0_17 = arith.constant 0 : index
      %c0_18 = arith.constant 0 : index
      %23 = vector.load %arg5[%c0_17, %c0_18] : memref<1x128xf32, #tpu.memory_space<vmem>>, vector<1x128xf32>
      %c0_19 = arith.constant 0 : index
      %c0_20 = arith.constant 0 : index
      %24 = vector.load %arg6[%c0_19, %c0_20] : memref<1x128xf32, #tpu.memory_space<vmem>>, vector<1x128xf32>
      %cst_21 = arith.constant dense<0.000000e+00> : vector<8xf32>
      %25 = vector.multi_reduction <add>, %22, %cst_21 [1] : vector<8x128xf32> to vector<8xf32>
      %26 = vector.shape_cast %25 : vector<8xf32> to vector<8x1xf32>
      %cst_22 = arith.constant 1.280000e+02 : f32
      %27 = vector.broadcast %cst_22 : f32 to vector<8x1xf32>
      %28 = arith.divf %26, %27 : vector<8x1xf32>
      %29 = arith.mulf %22, %22 : vector<8x128xf32>
      %cst_23 = arith.constant dense<0.000000e+00> : vector<8xf32>
      %30 = vector.multi_reduction <add>, %29, %cst_23 [1] : vector<8x128xf32> to vector<8xf32>
      %31 = vector.shape_cast %30 : vector<8xf32> to vector<8x1xf32>
      %cst_24 = arith.constant 1.280000e+02 : f32
      %32 = vector.broadcast %cst_24 : f32 to vector<8x1xf32>
      %33 = arith.divf %31, %32 : vector<8x1xf32>
      %34 = arith.mulf %28, %28 : vector<8x1xf32>
      %35 = arith.subf %33, %34 : vector<8x1xf32>
      %cst_25 = arith.constant 0.000000e+00 : f32
      %36 = vector.broadcast %cst_25 : f32 to vector<8x1xf32>
      %37 = arith.maximumf %35, %36 : vector<8x1xf32>
      %38 = vector.broadcast %28 : vector<8x1xf32> to vector<8x128xf32>
      %39 = arith.subf %22, %38 : vector<8x128xf32>
      %cst_26 = arith.constant 9.99999974E-6 : f32
      %40 = vector.broadcast %cst_26 : f32 to vector<8x1xf32>
      %41 = arith.addf %37, %40 : vector<8x1xf32>
      %42 = math.rsqrt %41 : vector<8x1xf32>
      %43 = vector.broadcast %42 : vector<8x1xf32> to vector<8x128xf32>
      %44 = arith.mulf %39, %43 : vector<8x128xf32>
      %45 = vector.broadcast %23 : vector<1x128xf32> to vector<8x128xf32>
      %46 = arith.mulf %44, %45 : vector<8x128xf32>
      %47 = vector.broadcast %24 : vector<1x128xf32> to vector<8x128xf32>
      %48 = arith.addf %46, %47 : vector<8x128xf32>
      %49 = arith.truncf %48 : vector<8x128xf32> to vector<8x128xbf16>
      %c0_27 = arith.constant 0 : index
      %c0_28 = arith.constant 0 : index
      %50 = vector.load %arg7[%c0_27, %c0_28] : memref<128x128xbf16, #tpu.memory_space<vmem>>, vector<128x128xbf16>
      %cst_29 = arith.constant dense<0.000000e+00> : vector<8x128xf32>
      %51 = tpu.matmul %49, %50, %cst_29 {dimension_numbers = #tpu.dot_dimension_numbers<[1], [0], [0], [1], [0, 0, 1, 1], [], []>} : vector<8x128xbf16>, vector<128x128xbf16>, vector<8x128xf32> -> vector<8x128xf32>
      %c0_30 = arith.constant 0 : index
      %c0_31 = arith.constant 0 : index
      %52 = vector.load %arg8[%c0_30, %c0_31] : memref<1x128xf32, #tpu.memory_space<vmem>>, vector<1x128xf32>
      %53 = vector.broadcast %52 : vector<1x128xf32> to vector<8x128xf32>
      %54 = arith.addf %51, %53 : vector<8x128xf32>
      %cst_32 = arith.constant 0.000000e+00 : f32
      %55 = vector.broadcast %cst_32 : f32 to vector<8x128xf32>
      %56 = arith.maximumf %54, %55 : vector<8x128xf32>
      %c0_33 = arith.constant 0 : index
      %c0_34 = arith.constant 0 : index
      %57 = vector.load %arg9[%c0_33, %c0_34] : memref<1x128xf32, #tpu.memory_space<vmem>>, vector<1x128xf32>
      %c0_35 = arith.constant 0 : index
      %c0_36 = arith.constant 0 : index
      %58 = vector.load %arg10[%c0_35, %c0_36] : memref<1x128xf32, #tpu.memory_space<vmem>>, vector<1x128xf32>
      %cst_37 = arith.constant dense<0.000000e+00> : vector<8xf32>
      %59 = vector.multi_reduction <add>, %56, %cst_37 [1] : vector<8x128xf32> to vector<8xf32>
      %60 = vector.shape_cast %59 : vector<8xf32> to vector<8x1xf32>
      %cst_38 = arith.constant 1.280000e+02 : f32
      %61 = vector.broadcast %cst_38 : f32 to vector<8x1xf32>
      %62 = arith.divf %60, %61 : vector<8x1xf32>
      %63 = arith.mulf %56, %56 : vector<8x128xf32>
      %cst_39 = arith.constant dense<0.000000e+00> : vector<8xf32>
      %64 = vector.multi_reduction <add>, %63, %cst_39 [1] : vector<8x128xf32> to vector<8xf32>
      %65 = vector.shape_cast %64 : vector<8xf32> to vector<8x1xf32>
      %cst_40 = arith.constant 1.280000e+02 : f32
      %66 = vector.broadcast %cst_40 : f32 to vector<8x1xf32>
      %67 = arith.divf %65, %66 : vector<8x1xf32>
      %68 = arith.mulf %62, %62 : vector<8x1xf32>
      %69 = arith.subf %67, %68 : vector<8x1xf32>
      %cst_41 = arith.constant 0.000000e+00 : f32
      %70 = vector.broadcast %cst_41 : f32 to vector<8x1xf32>
      %71 = arith.maximumf %69, %70 : vector<8x1xf32>
      %72 = vector.broadcast %62 : vector<8x1xf32> to vector<8x128xf32>
      %73 = arith.subf %56, %72 : vector<8x128xf32>
      %cst_42 = arith.constant 9.99999974E-6 : f32
      %74 = vector.broadcast %cst_42 : f32 to vector<8x1xf32>
      %75 = arith.addf %71, %74 : vector<8x1xf32>
      %76 = math.rsqrt %75 : vector<8x1xf32>
      %77 = vector.broadcast %76 : vector<8x1xf32> to vector<8x128xf32>
      %78 = arith.mulf %73, %77 : vector<8x128xf32>
      %79 = vector.broadcast %57 : vector<1x128xf32> to vector<8x128xf32>
      %80 = arith.mulf %78, %79 : vector<8x128xf32>
      %81 = vector.broadcast %58 : vector<1x128xf32> to vector<8x128xf32>
      %82 = arith.addf %80, %81 : vector<8x128xf32>
      %83 = arith.addf %48, %82 : vector<8x128xf32>
      %84 = arith.truncf %83 : vector<8x128xf32> to vector<8x128xbf16>
      %c0_43 = arith.constant 0 : index
      %c0_44 = arith.constant 0 : index
      %85 = vector.load %arg14[%c0_43, %c0_44] : memref<8x128xbf16, #tpu.memory_space<vmem>>, vector<8x128xbf16>
      tpu.vector_store %arg14[%c0_43, %c0_44], %84 {strides = array<i32>} : memref<8x128xbf16, #tpu.memory_space<vmem>>, vector<8x128xbf16>,
    } else {
    }
    %c0 = arith.constant 0 : index
    %c0_1 = arith.constant 0 : index
    %3 = vector.load %arg14[%c0, %c0_1] : memref<8x128xbf16, #tpu.memory_space<vmem>>, vector<8x128xbf16>
    %c0_2 = arith.constant 0 : index
    %c0_3 = arith.constant 0 : index
    %4 = vector.load %arg11[%c0_2, %c0_3] : memref<128x128xbf16, #tpu.memory_space<vmem>>, vector<128x128xbf16>
    %cst = arith.constant dense<0.000000e+00> : vector<8x128xf32>
    %5 = tpu.matmul %3, %4, %cst {dimension_numbers = #tpu.dot_dimension_numbers<[1], [0], [0], [1], [0, 0, 1, 1], [], []>} : vector<8x128xbf16>, vector<128x128xbf16>, vector<8x128xf32> -> vector<8x128xf32>
    %c0_4 = arith.constant 0 : index
    %c0_5 = arith.constant 0 : index
    %6 = vector.load %arg12[%c0_4, %c0_5] : memref<1x128xf32, #tpu.memory_space<vmem>>, vector<1x128xf32>
    %7 = vector.broadcast %6 : vector<1x128xf32> to vector<8x128xf32>
    %8 = arith.addf %5, %7 : vector<8x128xf32>
    %9 = arith.negf %8 : vector<8x128xf32>
    %10 = math.exp %9 : vector<8x128xf32>
    %cst_6 = arith.constant 1.000000e+00 : f32
    %11 = vector.broadcast %cst_6 : f32 to vector<8x128xf32>
    %12 = arith.addf %11, %10 : vector<8x128xf32>
    %13 = arith.divf %11, %12 : vector<8x128xf32>
    %c0_7 = arith.constant 0 : index
    %c0_8 = arith.constant 0 : index
    %14 = vector.load %arg13[%c0_7, %c0_8] : memref<8x128xf32, #tpu.memory_space<vmem>>, vector<8x128xf32>
    tpu.vector_store %arg13[%c0_7, %c0_8], %13 {strides = array<i32>} : memref<8x128xf32, #tpu.memory_space<vmem>>, vector<8x128xf32>,
    return
  }
  func.func @transform_0(%arg0: i32, %arg1: i32) -> (i32, i32) {
    %c0_i32 = arith.constant 0 : i32
    %c0_i32_0 = arith.constant 0 : i32
    return %arg0, %c0_i32 : i32, i32
  }
  func.func @transform_1(%arg0: i32, %arg1: i32) -> (i32, i32) {
    %c0_i32 = arith.constant 0 : i32
    %c0_i32_0 = arith.constant 0 : i32
    %c0_i32_1 = arith.constant 0 : i32
    return %c0_i32, %c0_i32_0 : i32, i32
  }
  func.func @transform_2(%arg0: i32, %arg1: i32) -> (i32, i32) {
    %c0_i32 = arith.constant 0 : i32
    %c0_i32_0 = arith.constant 0 : i32
    %c0_i32_1 = arith.constant 0 : i32
    return %c0_i32, %c0_i32_0 : i32, i32
  }
  func.func @transform_3(%arg0: i32, %arg1: i32) -> (i32, i32) {
    %c0_i32 = arith.constant 0 : i32
    %c0_i32_0 = arith.constant 0 : i32
    %c0_i32_1 = arith.constant 0 : i32
    return %c0_i32, %c0_i32_0 : i32, i32
  }
  func.func @transform_4(%arg0: i32, %arg1: i32) -> (i32, i32) {
    %c0_i32 = arith.constant 0 : i32
    %c0_i32_0 = arith.constant 0 : i32
    %c0_i32_1 = arith.constant 0 : i32
    return %c0_i32, %c0_i32_0 : i32, i32
  }
  func.func @transform_5(%arg0: i32, %arg1: i32) -> (i32, i32) {
    %c0_i32 = arith.constant 0 : i32
    %c0_i32_0 = arith.constant 0 : i32
    %c0_i32_1 = arith.constant 0 : i32
    return %c0_i32, %c0_i32_0 : i32, i32
  }
  func.func @transform_6(%arg0: i32, %arg1: i32) -> (i32, i32) {
    %c0_i32 = arith.constant 0 : i32
    %c0_i32_0 = arith.constant 0 : i32
    %c0_i32_1 = arith.constant 0 : i32
    return %c0_i32, %c0_i32_0 : i32, i32
  }
  func.func @transform_7(%arg0: i32, %arg1: i32) -> (i32, i32) {
    %c0_i32 = arith.constant 0 : i32
    %c0_i32_0 = arith.constant 0 : i32
    %c0_i32_1 = arith.constant 0 : i32
    return %c0_i32, %c0_i32_0 : i32, i32
  }
  func.func @transform_8(%arg0: i32, %arg1: i32) -> (i32, i32) {
    %c0_i32 = arith.constant 0 : i32
    %c0_i32_0 = arith.constant 0 : i32
    %c0_i32_1 = arith.constant 0 : i32
    return %c0_i32, %c0_i32_0 : i32, i32
  }
  func.func @transform_9(%arg0: i32, %arg1: i32) -> (i32, i32) {
    %c0_i32 = arith.constant 0 : i32
    %c0_i32_0 = arith.constant 0 : i32
    return %c0_i32, %arg1 : i32, i32
  }
  func.func @transform_10(%arg0: i32, %arg1: i32) -> (i32, i32) {
    %c0_i32 = arith.constant 0 : i32
    %c0_i32_0 = arith.constant 0 : i32
    return %c0_i32, %arg1 : i32, i32
  }
  func.func @transform_11(%arg0: i32, %arg1: i32) -> (i32, i32) {
    %c0_i32 = arith.constant 0 : i32
    return %arg0, %arg1 : i32, i32
  }
}

</mosaic_0001>

<bundles_post_ra>
// kernel: tpu_custom_call.1
= control target key start
LH: loop header
LB: loop body
LE: loop exit
PB: predicated region body
PF: predicated region fallthrough
CT: control target
= control target key end

     0   :  { %s2282_s0 = inlined_call_operand.hbm [shape: bf16[16,256], index: 0, kind: input, shape index: {}]   ;;  %s2283_s1 = inlined_call_operand.hbm [shape: bf16[256,128], index: 1, kind: input, shape index: {}]   ;;  %s2284_s2 = inlined_call_operand.vmem [shape: f32[1,128], index: 2, kind: input, shape index: {}]   ;;  %s2285_s3 = inlined_call_operand.vmem [shape: f32[1,128], index: 3, kind: input, shape index: {}]   ;;  %s2286_s4 = inlined_call_operand.vmem [shape: f32[1,128], index: 4, kind: input, shape index: {}]   ;;  %s2287_s5 = inlined_call_operand.hbm [shape: bf16[128,128], index: 5, kind: input, shape index: {}]   ;;  %s2288_s6 = inlined_call_operand.vmem [shape: f32[1,128], index: 6, kind: input, shape index: {}]   ;;  %s2289_s7 = inlined_call_operand.vmem [shape: f32[1,128], index: 7, kind: input, shape index: {}]   ;;  %s2290_s8 = inlined_call_operand.vmem [shape: f32[1,128], index: 8, kind: input, shape index: {}]   ;;  %s2291_s9 = inlined_call_operand.hbm [shape: bf16[128,384], index: 9, kind: input, shape index: {}]   ;;  %s2292_s10 = inlined_call_operand.vmem [shape: f32[1,384], index: 10, kind: input, shape index: {}]   ;;  %s2293_s11 = inlined_call_operand.hbm [shape: f32[16,384], index: 11, kind: output, shape index: {}]  }
   0x1   :  { %2310 = sst [smem:[#allocation23_spill]] %s2283_s1 }
   0x2   :  { %2311 = sst [smem:[#allocation24_spill]] %s2284_s2 }
   0x3   :  { %2312 = sst [smem:[#allocation25_spill]] %s2285_s3 }
   0x4   :  { %2313 = sst [smem:[#allocation26_spill]] %s2286_s4 }
   0x5   :  { %2314 = sst [smem:[#allocation27_spill]] %s2287_s5 }
   0x6   :  { %2315 = sst [smem:[#allocation28_spill]] %s2288_s6 }
   0x7   :  { %2316 = sst [smem:[#allocation29_spill]] %s2289_s7 }
   0x8   :  { %2317 = sst [smem:[#allocation30_spill]] %s2290_s8 }
   0x9   :  { %2318 = sst [smem:[#allocation31_spill]] %s2292_s10 }
   0xa   :  { %2319 = sst [smem:[#allocation32_spill]] %s2293_s11 }
   0xb   :  { %16 = vsyncpa [#allocation4], 0 }
   0xc   :  { %18 = vsyncpa [#allocation4 + $0x1], 0 }
   0xd   :  { %19 = vsyncpa [#allocation7], 0 }
   0xe   :  { %20 = vsyncpa [#allocation10], 0 }
   0xf   :  { %22 = vsyncpa [#allocation10 + $0x1], 0 }
  0x10   :  { %23 = vsyncpa [#allocation5], 0 }
  0x11   :  { %25 = vsyncpa [#allocation5 + $0x1], 0  ;;  %s1825_s17 = smov 0   ;;  %s1827_s18 = smov 0  }
  0x12   :  { %s1829_s19 = smov 0   ;;  %s1831_s20 = smov 0  }
  0x13   :  { %s1833_s21 = smov 0   ;;  %s1835_s22 = smov 0  }
  0x14   :  { %s1837_s23 = smov 0   ;;  %s1839_s24 = smov 0  }
  0x15   :  { %s1841_s25 = smov 0   ;;  %s1843_s26 = smov 0  }
  0x16   :  { %s1845_s27 = smov 0   ;;  %s1847_s28 = smov 0  }
  0x17   :  { %s1849_s29 = smov 0   ;;  %s1851_s30 = smov 0  }
  0x18 LB: > { %2320 = sst [smem:[#allocation16_spill]] %s1699_s17  ;;  %s1134_s12 = sadd.s32 4294967295, %s1751_s30   ;;  %s1751_s30 = sphi %s1851_s30, %s31_s30   ;;  %s1747_s29 = sphi %s1849_s29, %s2379_s29   ;;  %s1743_s28 = sphi %s1847_s28, %s2378_s28   ;;  %s1739_s27 = sphi %s1845_s27, %s2377_s27   ;;  %s1735_s26 = sphi %s1843_s26, %s2376_s26   ;;  %s1731_s25 = sphi %s1841_s25, %s2375_s25   ;;  %s1727_s24 = sphi %s1839_s24, %s2374_s24   ;;  %s1723_s23 = sphi %s1837_s23, %s2373_s23   ;;  %s1719_s22 = sphi %s1835_s22, %s2372_s22   ;;  %s1715_s21 = sphi %s1833_s21, %s2371_s21   ;;  %s1711_s20 = sphi %s1831_s20, %s2370_s20   ;;  %s1707_s19 = sphi %s1829_s19, %s2369_s19   ;;  %s1703_s18 = sphi %s1827_s18, %s2368_s18   ;;  %s1699_s17 = sphi %s1825_s17, %s2367_s17  }
  0x19   : > { %2321 = sst [smem:[#allocation17_spill]] %s1735_s26  ;;  %s1135_s13 = sadd.s32 4294967294, %s1751_s30  }
  0x1a   : > { %2322 = sst [smem:[#allocation18_spill]] %s1739_s27  ;;  %p1895_p0 = scmp.eq.s32.totalorder %s1134_s12, 0 }
  0x1b   : > { %p257_p1 = scmp.ne.s32.totalorder %s1715_s21, %s1711_s20  ;;  %p308_p2 = scmp.ne.s32.totalorder %s1707_s19, %s1703_s18 }
  0x1c   : > { %s2323_s14 = scalar_select %p1895_p0, 1, 0 }
  0x1d   : > { %p309_p3 = scmp.eq.s32.totalorder %s1134_s12, 5  ;;  %p1904_p4 = por %p257_p1, %p1895_p0 }
  0x1e   : > { %p314_p5 = scmp.ne.s32.totalorder %s1703_s18, %s1699_s17  ;;  %p315_p7 = scmp.eq.s32.totalorder %s1135_s13, 5 }
  0x1f   : > { %s2324_s15 = scalar_select %p1904_p4, 1, 0 }
  0x20   : > { %p1910_p6 = por %p309_p3, %p308_p2  ;;  %p1136_p8 = scmp.ge.s32.totalorder %s1751_s30, 1 }
  0x21   : > { %p322_p9 = scmp.lt.s32.totalorder %s1751_s30, 7  ;;  %p1916_p10 = por %p315_p7, %p314_p5 }
  0x22   : > { %s2325_s16 = scalar_select %p1910_p6, 1, 0 }
  0x23   : > { %s2327_s11 = scalar_select %p1916_p10, 1, 0 }
  0x24   : > { %2326 = sst [smem:[#allocation19_spill]] %s2325_s16  ;;  %p1920_p11 = pnand %p1136_p8, %p322_p9 }
  0x25   : > { %2328 = sst [smem:[#allocation20_spill]] %s2327_s11  ;;  %s1753_s12 = smov [#allocation6]  }
  0x26   : > { %s2329_s20 = scalar_select %p1920_p11, 1, 0 }
  0x27   : > { %s334_s27 = sshll.u32 %s1753_s12, 4  ;;  %p1294_p12 = pneg %p1920_p11  ;;  %s335_s27 = int_to_ptr.vmem [resolvable:$true] %s334_s27 }
  0x28   : > { %s1754_s13 = smov [#allocation8]   ;;  %s2331_s1 = sld [smem:[#allocation23_spill]] }
  0x29   : > { %p1928_p13 = pnand %p1294_p12, %p1895_p0  ;;  %s356_s16 = sshll.u32 %s1754_s13, 4  ;;  %s1932_s16 = int_to_ptr.vmem [resolvable:$true] %s356_s16 }
  0x2b   : > { %p1483_p2 = pneg %p1928_p13 }
  0x2e   : > { %s1481_s7 = scalar_lea.hbm %s2331_s1, 2048 }
  0x2f   : > { %p1482_p1 = scmp.ne.s32.totalorder %s2331_s1, %s1481_s7  ;;  %p1488_p7 = scmp.lt.u32.totalorder %s1481_s7, %s2331_s1 }
  0x31   : > { %p1484_p3 = pnand %p1483_p2, %p1482_p1 }
  0x33   : > { %p1485_p5 = pneg %p1484_p3 }
  0x35   : > { %p1490_p8 = pnand %p1488_p7, %p1485_p5 }
  0x37   : > { %1493 = shalt.err (!%p1490_p8)
}
  0x38   : > { %s1494_s13 = scalar_lea.vmem %s335_s27, 2048  ;;  %p1502_p6 = scmp.lt.s32.totalorder %s335_s27, %s335_s27 }
  0x39   : > { %p1495_p9 = scmp.ne.s32.totalorder %s335_s27, %s1494_s13  ;;  %p1503_p4 = scmp.lt.s32.totalorder %s1494_s13, %s1494_s13 }
  0x3b   : > { %p1497_p12 = pnand %p1495_p9, %p1483_p2  ;;  %p1504_p11 = por %p1503_p4, %p1502_p6 }
  0x3d   : > { %p1498_p10 = pneg %p1497_p12 }
  0x3f   : > { %p1505_p0 = pnand %p1504_p11, %p1498_p10 }
  0x41   : > { %1508 = shalt.err (!%p1505_p0)
}
  0x42   : > { %s2305_s6 = smov 64   ;;  %s2306_s8 = smov 4  }
  0x43   : > { %1297 = dma.hbm_to_vmem [thread:$0]  (!%p1928_p13), %s2331_s1, 2048, %s335_s27, [#allocation7], %s2305_s6, %s2305_s6, %s2306_s8  }
  0x44   : > { %s2332_s5 = sld [smem:[#allocation27_spill]] }
  0x4a   : > { %s1509_s12 = scalar_lea.hbm %s2332_s5, 1024 }
  0x4b   : > { %p1510_p0 = scmp.ne.s32.totalorder %s2332_s5, %s1509_s12  ;;  %p1516_p10 = scmp.lt.u32.totalorder %s1509_s12, %s2332_s5 }
  0x4d   : > { %p1512_p4 = pnand %p1510_p0, %p1483_p2 }
  0x4f   : > { %p1513_p6 = pneg %p1512_p4 }
  0x51   : > { %p1518_p11 = pnand %p1516_p10, %p1513_p6 }
  0x53   : > { %1521 = shalt.err (!%p1518_p11)
}
  0x54   : > { %s1522_s27 = scalar_lea.vmem %s1932_s16, 1024  ;;  %p1530_p7 = scmp.lt.s32.totalorder %s1932_s16, %s1932_s16 }
  0x55   : > { %p1523_p1 = scmp.ne.s32.totalorder %s1932_s16, %s1522_s27  ;;  %p1531_p8 = scmp.lt.s32.totalorder %s1522_s27, %s1522_s27 }
  0x57   : > { %p1525_p3 = pnand %p1523_p1, %p1483_p2  ;;  %p1532_p9 = por %p1531_p8, %p1530_p7 }
  0x59   : > { %p1526_p5 = pneg %p1525_p3 }
  0x5b   : > { %p1533_p12 = pnand %p1532_p9, %p1526_p5 }
  0x5d   : > { %1536 = shalt.err (!%p1533_p12)
}
  0x5e   : > { %1300 = dma.hbm_to_vmem [thread:$0]  (!%p1928_p13), %s2332_s5, 1024, %s1932_s16, [#allocation7], %s2305_s6, %s2305_s6, %s2306_s8  }
  0x5f   : > { %s40_s17 = sadd.s32 1, %s1743_s28  ;;  %s43_s26 = sadd.s32 1, %s1747_s29 }
  0x60   : > { %p41_p2 = scmp.ge.s32.totalorder %s40_s17, 3  ;;  %s50_s3 = sadd.s32 1, %s1731_s25 }
  0x61   : > { %p57_p0 = scmp.ne.s32.totalorder %s1731_s25, %s1727_s24  ;;  %p58_p4 = scmp.eq.s32.totalorder %s1751_s30, 0 }
  0x62   : > { %s2381_s17 = smov (%p41_p2, %s40_s17), 0  ;;  %s2383_s26 = smov (!%p41_p2, %s43_s26), %s1747_s29 }
  0x63   : > { %2333 = sst [smem:[#allocation21_spill]] %s2381_s17  ;;  %p63_p6 = scmp.ne.s32.totalorder %s1727_s24, %s1723_s23 }
  0x64   : > { %p45_p13 = scmp.ge.s32.totalorder %s2383_s26, 2  ;;  %s241_s16 = ssub.s32 %s1743_s28, %s2381_s17 }
  0x65   : > { %p2002_p10 = por %p58_p4, %p57_p0  ;;  %p2335_p11 = scmp.ne.s32.totalorder %s2323_s14, 0 }
  0x66   : > { %s2385_s26 = smov (%p45_p13, %s2383_s26), 0  ;;  %p242_p3 = scmp.eq.s32.totalorder %s241_s16, 0 }
  0x67   : > { %p2008_p1 = por %p2335_p11, %p63_p6  ;;  %2337 = sst [smem:[#allocation22_spill]] %s2385_s26 }
  0x68   : > { %s244_s23 = sadd.s32 1, %s1719_s22  ;;  %s47_s11 = ssub.s32 %s1747_s29, %s2385_s26 }
  0x69   : > { %s2336_s7 = scalar_select %p2008_p1, 1, 0 }
  0x6a   : > { %p251_p5 = scmp.ne.s32.totalorder %s1719_s22, %s1715_s21  ;;  %p48_p7 = scmp.eq.s32.totalorder %s47_s11, 0 }
  0x6b   : > { %s295_s12 = sor.u32 %s241_s16, %s47_s11  ;;  %s298_s10 = sadd.s32 1, %s1707_s19 }
  0x6c   : > { %s2020_s13 = scalar_select %p242_p3, %s1719_s22, %s244_s23  }
  0x6d   : > { %s2023_s27 = scalar_select %p48_p7, %s1731_s25, %s50_s3  }
  0x6e   : > { %p2027_p8 = por %p251_p5, %p58_p4  ;;  %p296_p9 = scmp.eq.s32.totalorder %s295_s12, 0 }
  0x6f   : > { %p1314_p12 = scmp.lt.s32.totalorder %s1751_s30, 6  ;;  %s379_s8 = sand.u32 1, %s1731_s25  }
  0x70   : > { %s2034_s6 = scalar_select %p296_p9, %s1707_s19, %s298_s10  }
  0x71   : > { %s1198_s1 = sshll.u32 %s1747_s29, 7  ;;  %s1140_s5 = sshll.u32 %s379_s8, 3 }
  0x72   : > { %s2041_s11 = scalar_lea.hbm %s2282_s0, %s1198_s1  ;;  %s383_s3 = scalar_lea.vmem [#allocation3], %s1140_s5 }
  0x73   : > { %s391_s26 = sshll.u32 %s383_s3, 4  ;;  %p2045_p2 = pnand %p1314_p12, %p2002_p10  ;;  %s2049_s26 = int_to_ptr.vmem [resolvable:$true] %s391_s26 }
  0x74   : > { %p2053_p0 = pnand %p1314_p12, %p2027_p8  ;;  %s398_s1 = sand.u32 1, %s1719_s22  }
  0x75   : > { %s380_s16 = scalar_lea.sflag [#allocation4], %s379_s8  ;;  %s1537_s23 = scalar_lea.hbm %s2041_s11, 128 }
  0x76   : > { %p1538_p4 = scmp.ne.s32.totalorder %s2041_s11, %s1537_s23  ;;  %p1539_p6 = pneg %p2045_p2 }
  0x77   : > { %s1542_s3 = scalar_lea.hbm %s2282_s0, 256  ;;  %p1543_p11 = scmp.lt.u32.totalorder %s2041_s11, %s2282_s0 }
  0x78   : > { %p1540_p13 = pnand %p1539_p6, %p1538_p4  ;;  %p1544_p3 = scmp.lt.u32.totalorder %s1542_s3, %s1537_s23 }
  0x79   : > { %p1546_p7 = scmp.lt.u32.totalorder %s1537_s23, %s2041_s11 }
  0x7a   : > { %p1541_p10 = pneg %p1540_p13  ;;  %p1545_p5 = por %p1544_p3, %p1543_p11 }
  0x7c   : > { %p1547_p8 = por %p1546_p7, %p1545_p5 }
  0x7e   : > { %p1548_p9 = pnand %p1547_p8, %p1541_p10 }
  0x80   : > { %1551 = shalt.err (!%p1548_p9)
}
  0x81   : > { %s1552_s8 = scalar_lea.vmem %s2049_s26, 128  ;;  %s1757_s5 = smov [#allocation3]  }
  0x82   : > { %p1553_p12 = scmp.ne.s32.totalorder %s2049_s26, %s1552_s8  ;;  %s1557_s4 = sshll.u32 %s1757_s5, 4  ;;  %s1558_s4 = int_to_ptr.vmem [resolvable:$false] %s1557_s4 }
  0x83   : > { %s1559_s17 = scalar_lea.vmem %s1558_s4, 256  ;;  %p1560_p1 = scmp.lt.s32.totalorder %s2049_s26, %s1558_s4 }
  0x84   : > { %p1555_p4 = pnand %p1553_p12, %p1539_p6  ;;  %p1561_p11 = scmp.lt.s32.totalorder %s1559_s17, %s1552_s8 }
  0x86   : > { %p1556_p13 = pneg %p1555_p4  ;;  %p1562_p3 = por %p1561_p11, %p1560_p1 }
  0x88   : > { %p1563_p5 = pnand %p1562_p3, %p1556_p13 }
  0x8a   : > { %1566 = shalt.err (!%p1563_p5)
}
  0x8b   : > { %1304 = dma.hbm_to_vmem [thread:$0]  (!%p2045_p2), %s2041_s11, 128, %s2049_s26, %s380_s16  }
  0x8c   : > { %s1143_s23 = sshll.u32 %s398_s1, 6  ;;  %s1144_s3 = sshll.u32 %s1743_s28, 6 }
  0x8d   : > { %s2089_s8 = scalar_lea.hbm %s2291_s9, %s1144_s3  ;;  %s402_s12 = scalar_lea.vmem [#allocation9], %s1143_s23 }
  0x8e   : > { %s408_s4 = sshll.u32 %s402_s12, 4  ;;  %s2095_s17 = scalar_lea.sflag [#allocation10], %s398_s1  ;;  %s2091_s4 = int_to_ptr.vmem [resolvable:$true] %s408_s4 }
  0x8f   : > { %s1567_s26 = scalar_lea.hbm %s2089_s8, 1024  ;;  %p1569_p2 = pneg %p2053_p0 }
  0x90   : > { %p1568_p1 = scmp.ne.s32.totalorder %s2089_s8, %s1567_s26  ;;  %s1572_s3 = scalar_lea.hbm %s2291_s9, 3072 }
  0x91   : > { %p1573_p7 = scmp.lt.u32.totalorder %s2089_s8, %s2291_s9  ;;  %p1574_p8 = scmp.lt.u32.totalorder %s1572_s3, %s1567_s26 }
  0x92   : > { %p1570_p6 = pnand %p1569_p2, %p1568_p1  ;;  %p1576_p12 = scmp.lt.u32.totalorder %s1567_s26, %s2089_s8 }
  0x93   : > { %p1575_p9 = por %p1574_p8, %p1573_p7 }
  0x94   : > { %p1571_p10 = pneg %p1570_p6 }
  0x95   : > { %p1577_p4 = por %p1576_p12, %p1575_p9 }
  0x97   : > { %p1578_p13 = pnand %p1577_p4, %p1571_p10 }
  0x99   : > { %1581 = shalt.err (!%p1578_p13)
}
  0x9a   : > { %s1582_s1 = scalar_lea.vmem %s2091_s4, 1024  ;;  %s1758_s5 = smov [#allocation9]  }
  0x9b   : > { %p1583_p11 = scmp.ne.s32.totalorder %s2091_s4, %s1582_s1  ;;  %s1587_s12 = sshll.u32 %s1758_s5, 4  ;;  %s1588_s12 = int_to_ptr.vmem [resolvable:$false] %s1587_s12 }
  0x9c   : > { %s1589_s11 = scalar_lea.vmem %s1588_s12, 2048  ;;  %p1590_p1 = scmp.lt.s32.totalorder %s2091_s4, %s1588_s12 }
  0x9d   : > { %p1585_p3 = pnand %p1583_p11, %p1569_p2  ;;  %p1591_p6 = scmp.lt.s32.totalorder %s1589_s11, %s1582_s1 }
  0x9f   : > { %p1586_p5 = pneg %p1585_p3  ;;  %p1592_p7 = por %p1591_p6, %p1590_p1 }
  0xa1   : > { %p1593_p8 = pnand %p1592_p7, %p1586_p5 }
  0xa3   : > { %1596 = shalt.err (!%p1593_p8)
}
  0xa4   : > { %s1759_s26 = smov 192   ;;  %s2341_s16 = smov 4  }
  0xa5   : > { %s2342_s3 = smov 64   ;;  %p2343_p2 = scmp.ne.s32.totalorder %s2329_s20, 0 }
  0xa6   : > { %1307 = dma.hbm_to_vmem [thread:$0]  (!%p2053_p0), %s2089_s8, 1024, %s2091_s4, %s2095_s17, %s1759_s26, %s2342_s3, %s2341_s16  }
  0xa7   : > { %426 = sbr.rel (%p2343_p2) target bundleno = 1294 (0x50e), region = 64  ;;  %s428_s2 = sand.u32 (!%p2343_p2), 1, %s1727_s24  }
  0xa8   : > { %s2128_s23 = sshll.u32 (!%p2343_p2), %s428_s2, 3  ;;  %s429_s1 = scalar_lea.sflag (!%p2343_p2), [#allocation4], %s428_s2 }
  0xa9   : > { %s432_s5 = scalar_lea.vmem (!%p2343_p2), [#allocation3], %s2128_s23  ;;  %p2344_p10 = scmp.ne.s32.totalorder (!%p2343_p2), %s2336_s7, 0 }
  0xae   : > { %1682 = dma.done.wait (%p2344_p10), %s429_s1, 128  }
  0xaf   : > { %1684 = vsyncadd (%p2344_p10), %s429_s1, 4294967168  ;;  %p2345_p9 = scmp.ne.s32.totalorder %s2323_s14, 0 }
  0xb1   : > { %1686 = dma.done.wait (%p2345_p9), [#allocation7], 3072  }
  0xb2   : > { %1688 = vsyncadd (%p2345_p9), [#allocation7], 4294964224  ;;  %s445_s20 = sand.u32 1, %s1715_s21   ;;  %p2346_p0 = scmp.ne.s32.totalorder %s2324_s15, 0 }
  0xb3   : > { %s1149_s10 = sshll.u32 %s445_s20, 6  ;;  %s446_s8 = scalar_lea.sflag [#allocation10], %s445_s20 }
  0xb4   : > { %s2140_s4 = scalar_lea.vmem [#allocation9], %s1149_s10 }
  0xb5   : > { %1690 = dma.done.wait (%p2346_p0), %s446_s8, 1024  }
  0xb6   : > { %1692 = vsyncadd (%p2346_p0), %s446_s8, 4294966272  ;;  %s2347_s7 = sld [smem:[#allocation17_spill]]  ;;  %s493_s17 = sand.u32 1, %s1703_s18  }
  0xb7   : > { %s2150_s14 = sshll.u32 %s493_s17, 3  ;;  %s2348_s16 = sld [smem:[#allocation31_spill]] }
  0xb8   : > { %s495_s2 = scalar_lea.vmem [#allocation11], %s2150_s14 }
  0xbc   : > { %p496_p12 = scmp.lt.s32.totalorder %s2347_s7, 2  ;;  %p1151_p4 = scmp.ne.s32.totalorder %s2347_s7, 0 }
  0xbd   : > { %v1439_v0 = vld [vmem:[#allocation6 + $0x40] sm:$0xff] (!%p1151_p4)   ;;  %v1441_v2 = vld [vmem:[#allocation6 + $0x48] sm:$0xff] (!%p1151_p4)   ;;  %v1443_v4 = vld [vmem:[#allocation6 + $0x50] sm:$0xff] (!%p1151_p4)   ;;  %v1760_v19 = vmov (!%p1151_p4), 0.0   ;;  %s2349_s1 = sld [smem:[#allocation24_spill]] (!%p1151_p4)  ;;  %vm1761_vm0 = vmmov (!%p1151_p4), 0  }
  0xbe   : > { %s2153_s12 = scalar_select %p496_p12, %s2347_s7, 2 }
  0xbf   : > { %503 = sbr.rel (%p1151_p4) target bundleno = 1007 (0x3ef), region = 84  ;;  %v1440_v1 = vld [vmem:[#allocation6] sm:$0xff] (!%p1151_p4)   ;;  %1199 = vmatprep.subr.bf16.mxu0 (!%p1151_p4), %v1439_v0  ;;  %v1442_v3 = vld [vmem:[#allocation6 + $0x8] sm:$0xff] (!%p1151_p4)   ;;  %v1444_v5 = vld [vmem:[#allocation6 + $0x10] sm:$0xff] (!%p1151_p4)   ;;  %1239 = vmatprep.subr.bf16.mxu1 (!%p1151_p4), %v1760_v19  ;;  %s2350_s10 = sld [smem:[#allocation25_spill]] (!%p1151_p4) }
  0xc0   : > { %s498_s3 = scalar_lea.vmem %s2348_s16, %s2153_s12  ;;  %1200 = vmatpush3.bf16.msra.mxu0 (!%p1151_p4), %v1440_v1  ;;  %v1445_v6 = vld [vmem:[#allocation6 + $0x58] sm:$0xff] (!%p1151_p4)   ;;  %v1447_v8 = vld [vmem:[#allocation6 + $0x60] sm:$0xff] (!%p1151_p4)   ;;  %v1449_v10 = vld [vmem:[#allocation6 + $0x68] sm:$0xff] (!%p1151_p4)   ;;  %1255 = vmatprep.mubr.msk.bf16.mxu1 (!%p1151_p4), %vm1761_vm0, %v1760_v19  ;;  %s2351_s11 = sld [smem:[#allocation26_spill]] (!%p1151_p4) }
  0xc1   : > { %1201 = vmatprep.subr.bf16.mxu0 (!%p1151_p4), %v1441_v2  ;;  %v1446_v7 = vld [vmem:[#allocation6 + $0x18] sm:$0xff] (!%p1151_p4)   ;;  %v1448_v9 = vld [vmem:[#allocation6 + $0x20] sm:$0xff] (!%p1151_p4)   ;;  %v1450_v12 = vld [vmem:[#allocation6 + $0x28] sm:$0xff] (!%p1151_p4)   ;;  %s2352_s15 = sld [smem:[#allocation28_spill]] (!%p1151_p4)  ;;  %s2354_s8 = sld [smem:[#allocation30_spill]] (!%p1151_p4) }
  0xc2   : > { %v504_v11 = vld [vmem:[%s432_s5] sm:$0xff] (!%p1151_p4)  ;;  %v1457_v29 = vld [vmem:[#allocation8] sm:$0xff] (!%p1151_p4)   ;;  %v1458_v30 = vld [vmem:[#allocation8 + $0x8] sm:$0xff] (!%p1151_p4)   ;;  %s2353_s5 = sld [smem:[#allocation29_spill]] (!%p1151_p4) }
  0xc3   : > { %v1154_v13 = vcombine.high (!%p1151_p4), %v504_v11, %v504_v11  ;;  %v1451_v14 = vld [vmem:[#allocation6 + $0x70] sm:$0xff] (!%p1151_p4)   ;;  %v1453_v16 = vld [vmem:[#allocation6 + $0x78] sm:$0xff] (!%p1151_p4)   ;;  %v1153_v18 = vcombine.low (!%p1151_p4), %v504_v11, %v504_v11  ;;  %v1152_v21 = vld [vmem:[%s2349_s1] ss:$0 sm:$0xff] (!%p1151_p4)  ;;  %1240 = vmatpush3.bf16.msra.mxu1 (!%p1151_p4), %v1457_v29 }
  0xc4   : > { %1202 = vmatpush3.bf16.msra.mxu0 (!%p1151_p4), %v1442_v3  ;;  %v1452_v15 = vld [vmem:[#allocation6 + $0x30] sm:$0xff] (!%p1151_p4)   ;;  %v1454_v17 = vld [vmem:[#allocation6 + $0x38] sm:$0xff] (!%p1151_p4)   ;;  %1241 = vmatprep.subr.bf16.mxu1 (!%p1151_p4), %v1760_v19  ;;  %v1461_v33 = vld [vmem:[#allocation8 + $0x20] sm:$0xff] (!%p1151_p4)  }
  0xc5   : > { %1203 = vmatprep.subr.bf16.mxu0 (!%p1151_p4), %v1443_v4  ;;  %679 = vmatprep.mubr.bf16.mxu0 (!%p1151_p4), %v1154_v13  ;;  %v1459_v31 = vld [vmem:[#allocation8 + $0x10] sm:$0xff] (!%p1151_p4)   ;;  %v1460_v32 = vld [vmem:[#allocation8 + $0x18] sm:$0xff] (!%p1151_p4)   ;;  %v1462_v34 = vld [vmem:[#allocation8 + $0x28] sm:$0xff] (!%p1151_p4)  }
  0xc6   : > { %v1463_v35 = vld [vmem:[#allocation8 + $0x30] sm:$0xff]   ;;  %v1464_v36 = vld [vmem:[#allocation8 + $0x38] sm:$0xff]   ;;  %v1171_v47 = vld [vmem:[%s2350_s10] ss:$0 sm:$0xff] }
  0xc7   : > { %1242 = vmatpush3.bf16.msra.mxu1 %v1458_v30  ;;  %v1172_v49 = vld [vmem:[%s2351_s11] ss:$0 sm:$0xff] }
  0xc8   : > { %1204 = vmatpush3.bf16.msra.mxu0 %v1444_v5  ;;  %1243 = vmatprep.subr.bf16.mxu1 %v1760_v19  ;;  %v1173_v53 = vld [vmem:[%s2352_s15] ss:$0 sm:$0xff] }
  0xc9   : > { %1205 = vmatprep.subr.bf16.mxu0 %v1445_v6 }
  0xcb   : > { %1244 = vmatpush3.bf16.msra.mxu1 %v1459_v31 }
  0xcc   : > { %1206 = vmatpush3.bf16.msra.mxu0 %v1446_v7  ;;  %1245 = vmatprep.subr.bf16.mxu1 %v1760_v19  ;;  %v1182_v7 = vld [vmem:[%s2353_s5] ss:$0 sm:$0xff] }
  0xcd   : > { %1207 = vmatprep.subr.bf16.mxu0 %v1447_v8 }
  0xcf   : > { %1246 = vmatpush3.bf16.msra.mxu1 %v1460_v32 }
  0xd0   : > { %1208 = vmatpush3.bf16.msra.mxu0 %v1448_v9  ;;  %1247 = vmatprep.subr.bf16.mxu1 %v1760_v19  ;;  %v1183_v9 = vld [vmem:[%s2354_s8] ss:$0 sm:$0xff] }
  0xd1   : > { %1209 = vmatprep.subr.bf16.mxu0 %v1449_v10 }
  0xd3   : > { %1248 = vmatpush3.bf16.msra.mxu1 %v1461_v33 }
  0xd4   : > { %1210 = vmatpush3.bf16.msra.mxu0 %v1450_v12  ;;  %1249 = vmatprep.subr.bf16.mxu1 %v1760_v19 }
  0xd5   : > { %1211 = vmatprep.subr.bf16.mxu0 %v1451_v14 }
  0xd7   : > { %1250 = vmatpush3.bf16.msra.mxu1 %v1462_v34 }
  0xd8   : > { %1212 = vmatpush3.bf16.msra.mxu0 %v1452_v15  ;;  %1251 = vmatprep.subr.bf16.mxu1 %v1760_v19 }
  0xd9   : > { %1213 = vmatprep.subr.bf16.mxu0 %v1453_v16 }
  0xdb   : > { %1252 = vmatpush3.bf16.msra.mxu1 %v1463_v35 }
  0xdc   : > { %1214 = vmatpush3.bf16.msra.mxu0 %v1454_v17  ;;  %1253 = vmatprep.subr.bf16.mxu1 %v1760_v19 }
  0xdf   : > { %680 = vmatmul.mubr.bf16.vlgmr.msra.gmra.mrb[0].mxu0 %v1153_v18  ;;  %1254 = vmatpush3.bf16.msra.mxu1 %v1464_v36 }
 0x1b2   : > { %v1215_v20 = vpop.f32.mrb[0].mxu0 }
 0x1b3   : > { %v1216_v22 = vpop.f32.mrb[1].mxu0 }
 0x1b4   : > { %v1217_v23 = vadd.f32 %v1216_v22, %v1215_v20  ;;  %v1218_v24 = vpop.f32.mrb[2].mxu0 }
 0x1b5   : > { %v1219_v25 = vpop.f32.mrb[3].mxu0 }
 0x1b6   : > { %v682_v26 = vadd.f32 %v1217_v23, %v1152_v21 }
 0x1b8   : > { %v687_v27 = vmax.f32 %v682_v26, 0.0 }
 0x1ba   : > { %690 = vadd.xlane.f32.xlu0 %v687_v27  ;;  %v694_v28 = vmul.f32 %v687_v27, %v687_v27 }
 0x1be   : > { %695 = vadd.xlane.f32.xlu0 %v694_v28 }
 0x247   : > { %v691_v37 = vpop.xlane.xlu0 %690 }
 0x248   : > { %v693_v38 = vmul.f32 0.0078125, %v691_v37 }
 0x24a   : > { %v698_v40 = vmul.f32 %v693_v38, %v693_v38  ;;  %v701_v45 = vsub.f32 %v687_v27, %v693_v38 }
 0x24b   : > { %v696_v39 = vpop.xlane.xlu0 %695 }
 0x24c   : > { %v697_v41 = vmul.f32 0.0078125, %v696_v39 }
 0x24e   : > { %v699_v42 = vsub.f32 %v697_v41, %v698_v40 }
 0x250   : > { %v700_v43 = vmax.f32 %v699_v42, 0.0 }
 0x252   : > { %v702_v44 = vadd.f32 1e-05, %v700_v43 }
 0x254   : > { %1465 = vrsqrt.f32 %v702_v44 }
 0x25e   : > { %v1466_v46 = vpop.eup %1465 }
 0x25f   : > { %v704_v48 = vmul.f32 %v1466_v46, %v701_v45 }
 0x261   : > { %v711_v50 = vmul.f32 %v1171_v47, %v704_v48 }
 0x263   : > { %v718_v51 = vadd.f32 %v1172_v49, %v711_v50 }
 0x265   : > { %v719_v52 = vpack.c.bf16 %v718_v51, %v718_v51 }
 0x267   : > { %1256 = vmatmul.mubr.bf16.vlgmr.msra.gmra.mrb[0].mxu1 %v719_v52 }
 0x33a   : > { %v825_v54 = vpop.f32.mrb[0].mxu1 }
 0x33b   : > { %v826_v55 = vadd.f32 %v1173_v53, %v825_v54  ;;  %v1257_v56 = vpop.f32.mrb[1].mxu1 }
 0x33c   : > { %v828_v57 = vpop.f32.mrb[2].mxu1 }
 0x33d   : > { %v831_v58 = vmax.f32 %v826_v55, 0.0  ;;  %v1258_v59 = vpop.f32.mrb[3].mxu1 }
 0x33f   : > { %834 = vadd.xlane.f32.xlu1 %v831_v58  ;;  %v837_v60 = vmul.f32 %v831_v58, %v831_v58 }
 0x343   : > { %838 = vadd.xlane.f32.xlu1 %v837_v60 }
 0x3cc   : > { %v835_v61 = vpop.xlane.xlu1 %834 }
 0x3cd   : > { %v836_v62 = vmul.f32 0.0078125, %v835_v61 }
 0x3cf   : > { %v841_v0 = vmul.f32 %v836_v62, %v836_v62  ;;  %v844_v5 = vsub.f32 %v831_v58, %v836_v62 }
 0x3d0   : > { %v839_v63 = vpop.xlane.xlu1 %838 }
 0x3d1   : > { %v840_v1 = vmul.f32 0.0078125, %v839_v63 }
 0x3d3   : > { %v842_v2 = vsub.f32 %v840_v1, %v841_v0 }
 0x3d5   : > { %v843_v3 = vmax.f32 %v842_v2, 0.0 }
 0x3d7   : > { %v845_v4 = vadd.f32 1e-05, %v843_v3 }
 0x3d9   : > { %1467 = vrsqrt.f32 %v845_v4 }
 0x3e3   : > { %v1468_v6 = vpop.eup %1467 }
 0x3e4   : > { %v847_v8 = vmul.f32 %v1468_v6, %v844_v5 }
 0x3e6   : > { %v854_v10 = vmul.f32 %v1182_v7, %v847_v8 }
 0x3e8   : > { %v861_v11 = vadd.f32 %v1183_v9, %v854_v10 }
 0x3ea   : > { %v862_v12 = vadd.f32 %v861_v11, %v718_v51 }
 0x3ec   : > { %v863_v13 = vpack.c.bf16 %v862_v12, %v862_v12 }
 0x3ee   : > { %864 = vst [vmem:[#allocation2] sm:$0xf] %v863_v13 }
 0x3ef PF: > { %v1469_v14 = vld [vmem:[%s2140_s4] sm:$0xff]   ;;  %v1762_v15 = vmov 0.0   ;;  %v1470_v16 = vld [vmem:[%s2140_s4 + $0x8] sm:$0xff]   ;;  %vm1763_vm1 = vmmov 0   ;;  %v1471_v17 = vld [vmem:[%s2140_s4 + $0x10] sm:$0xff]   ;;  %s2355_s7 = sld [smem:[#allocation18_spill]] }
 0x3f0   : > { %1259 = vmatprep.subr.bf16.mxu0 %v1762_v15  ;;  %1275 = vmatprep.mubr.msk.bf16.mxu0 %vm1763_vm1, %v1762_v15  ;;  %v1472_v18 = vld [vmem:[%s2140_s4 + $0x18] sm:$0xff]   ;;  %v1473_v19 = vld [vmem:[%s2140_s4 + $0x20] sm:$0xff]   ;;  %v1474_v20 = vld [vmem:[%s2140_s4 + $0x28] sm:$0xff]   ;;  %s2356_s11 = sld [smem:[#allocation17_spill]]  ;;  %s1000_s20 = sshll.u32 %s495_s2, 4  ;;  %s2203_s20 = int_to_ptr.vmem [resolvable:$true] %s1000_s20 }
 0x3f1   : > { %1260 = vmatpush3.bf16.msra.mxu0 %v1469_v14  ;;  %v1475_v21 = vld [vmem:[%s2140_s4 + $0x30] sm:$0xff]   ;;  %v1476_v22 = vld [vmem:[%s2140_s4 + $0x38] sm:$0xff]   ;;  %v1184_v24 = vld [vmem:[%s498_s3] ss:$0 sm:$0xff]  ;;  %s2358_s4 = sld [smem:[#allocation19_spill]]  ;;  %s2359_s10 = sld [smem:[#allocation32_spill]] }
 0x3f2   : > { %1261 = vmatprep.subr.bf16.mxu0 %v1762_v15  ;;  %s1597_s26 = scalar_lea.vmem %s2203_s20, 128 }
 0x3f3   : > { %p1598_p13 = scmp.ne.s32.totalorder %s2203_s20, %s1597_s26 }
 0x3f5   : > { %1262 = vmatpush3.bf16.msra.mxu0 %v1470_v16  ;;  %v865_v23 = vld [vmem:[#allocation2] sm:$0xf]  ;;  %s1279_s23 = smul.u32 3, %s2355_s7  ;;  %s985_s7 = scalar_lea.sflag [#allocation5], %s493_s17 }
 0x3f6   : > { %1263 = vmatprep.subr.bf16.mxu0 %v1762_v15 }
 0x3f7   : > { %s996_s1 = sadd.s32 %s2356_s11, %s1279_s23  ;;  %p2360_p11 = scmp.ne.s32.totalorder %s2358_s4, 0 }
 0x3f8   : > { %s1195_s5 = sshll.u32 %s996_s1, 7  ;;  %s1764_s11 = smov [#allocation11]  }
 0x3f9   : > { %1264 = vmatpush3.bf16.msra.mxu0 %v1471_v17  ;;  %s2201_s8 = scalar_lea.hbm %s2359_s10, %s1195_s5  ;;  %p1599_p3 = pnand %p1598_p13, %p2360_p11 }
 0x3fa   : > { %1265 = vmatprep.subr.bf16.mxu0 %v1762_v15  ;;  %s1601_s16 = sshll.u32 %s1764_s11, 4  ;;  %s1602_s16 = int_to_ptr.vmem [resolvable:$false] %s1601_s16 }
 0x3fb   : > { %p1600_p5 = pneg %p1599_p3  ;;  %s1603_s15 = scalar_lea.vmem %s1602_s16, 256 }
 0x3fc   : > { %p1604_p1 = scmp.lt.s32.totalorder %s2203_s20, %s1602_s16  ;;  %p1605_p6 = scmp.lt.s32.totalorder %s1603_s15, %s1597_s26 }
 0x3fd   : > { %1266 = vmatpush3.bf16.msra.mxu0 %v1472_v18 }
 0x3fe   : > { %1267 = vmatprep.subr.bf16.mxu0 %v1762_v15  ;;  %p1606_p7 = por %p1605_p6, %p1604_p1 }
 0x400   : > { %p1607_p8 = pnand %p1606_p7, %p1600_p5 }
 0x401   : > { %1268 = vmatpush3.bf16.msra.mxu0 %v1473_v19 }
 0x402   : > { %1269 = vmatprep.subr.bf16.mxu0 %v1762_v15 }
 0x405   : > { %1270 = vmatpush3.bf16.msra.mxu0 %v1474_v20 }
 0x406   : > { %1271 = vmatprep.subr.bf16.mxu0 %v1762_v15 }
 0x409   : > { %1272 = vmatpush3.bf16.msra.mxu0 %v1475_v21 }
 0x40a   : > { %1273 = vmatprep.subr.bf16.mxu0 %v1762_v15 }
 0x40d   : > { %1274 = vmatpush3.bf16.msra.mxu0 %v1476_v22 }
 0x410   : > { %1276 = vmatmul.mubr.bf16.vlgmr.msra.gmra.mrb[0].mxu0 %v865_v23 }
 0x4e3   : > { %v971_v25 = vpop.f32.mrb[0].mxu0 }
 0x4e4   : > { %v972_v26 = vadd.f32 %v1184_v24, %v971_v25  ;;  %v1277_v27 = vpop.f32.mrb[1].mxu0 }
 0x4e5   : > { %v974_v28 = vpop.f32.mrb[2].mxu0 }
 0x4e6   : > { %v1193_v29 = vmul.f32 -1.442695, %v972_v26  ;;  %v1278_v30 = vpop.f32.mrb[3].mxu0 }
 0x4e8   : > { %1477 = vpow2.f32 %v1193_v29 }
 0x4f2   : > { %v1478_v31 = vpop.eup %1477 }
 0x4f3   : > { %v980_v32 = vadd.f32 1.0, %v1478_v31 }
 0x4f5   : > { %1479 = vrcp.f32 %v980_v32 }
 0x4ff   : > { %v1480_v33 = vpop.eup %1479 }
 0x500   : > { %983 = vst [vmem:[%s495_s2] sm:$0xff] %v1480_v33 }
 0x501   : > { %1610 = shalt.err (!%p1607_p8)
}
 0x502   : > { %s1611_s17 = scalar_lea.hbm %s2201_s8, 128  ;;  %s1615_s23 = scalar_lea.hbm %s2359_s10, 768 }
 0x503   : > { %p1612_p2 = scmp.ne.s32.totalorder %s2201_s8, %s1611_s17  ;;  %p1616_p0 = scmp.lt.u32.totalorder %s2201_s8, %s2359_s10 }
 0x504   : > { %p1617_p12 = scmp.lt.u32.totalorder %s1615_s23, %s1611_s17  ;;  %p1619_p13 = scmp.lt.u32.totalorder %s1611_s17, %s2201_s8 }
 0x505   : > { %p1613_p10 = pnand %p1612_p2, %p2360_p11 }
 0x506   : > { %p1618_p4 = por %p1617_p12, %p1616_p0 }
 0x507   : > { %p1614_p9 = pneg %p1613_p10 }
 0x508   : > { %p1620_p3 = por %p1619_p13, %p1618_p4 }
 0x50a   : > { %p1621_p5 = pnand %p1620_p3, %p1614_p9 }
 0x50c   : > { %1624 = shalt.err (!%p1621_p5)
}
 0x50d   : > { %1292 = dma.vmem_to_hbm [thread:$0]  (%p2360_p11), %s2203_s20, 128, %s2201_s8, %s985_s7  }
 0x50e PF: > { %s2361_s12 = sld [smem:[#allocation16_spill]]  ;;  %s2362_s3 = sld [smem:[#allocation20_spill]] }
 0x50f   : > { %p1317_p1 = scmp.ge.s32.totalorder %s1751_s30, 2 }
 0x514   : > { %s1012_s26 = sand.u32 1, %s2361_s12   ;;  %p2363_p6 = scmp.ne.s32.totalorder %s2362_s3, 0 }
 0x515   : > { %s1013_s11 = scalar_lea.sflag [#allocation5], %s1012_s26 }
 0x516   : > { %p1309_p7 = pnand %p1317_p1, %p2363_p6 }
 0x518   : > { %1694 = dma.done.wait (!%p1309_p7), %s1013_s11, 128  }
 0x519   : > { %1696 = vsyncadd (!%p1309_p7), %s1013_s11, 4294967168  ;;  %s31_s30 = sadd.s32 1, %s1751_s30   ;;  %s2365_s4 = sld [smem:[#allocation21_spill]] }
 0x51a   : > { %p2235_p8 = scmp.ge.s32.totalorder %s31_s30, 8   ;;  %s2366_s8 = sld [smem:[#allocation22_spill]] }
 0x51b   : > { %s2367_s17 = smov %s1703_s18  ;;  %s2368_s18 = smov %s1707_s19 }
 0x51c   : > { %s2369_s19 = smov %s2034_s6  ;;  %s2370_s20 = smov %s1715_s21 }
 0x51d   : > { %s2371_s21 = smov %s1719_s22  ;;  %s2372_s22 = smov %s2020_s13 }
 0x51e   : > { %s2373_s23 = smov %s1727_s24  ;;  %s2374_s24 = smov %s1731_s25 }
 0x51f   : > { %s2375_s25 = smov %s2023_s27  ;;  %s2376_s26 = smov %s1743_s28 }
 0x520   : > { %s2377_s27 = smov %s1747_s29  ;;  %s2378_s28 = smov %s2365_s4 }
 0x521   : > { %s2379_s29 = smov %s2366_s8  ;;  %30 = sbr.rel (!%p2235_p8) target bundleno = 24 (0x18), region = 137 }
 0x528   :  { %1018 = vsyncpa [#allocation4], 1 }
 0x529   :  { %1020 = vsyncpa [#allocation4 + $0x1], 1 }
 0x52a   :  { %1021 = vsyncpa [#allocation7], 1 }
 0x52b   :  { %1022 = vsyncpa [#allocation10], 1 }
 0x52c   :  { %1024 = vsyncpa [#allocation10 + $0x1], 1 }
 0x52d   :  { %1025 = vsyncpa [#allocation5], 1 }
 0x52e   :  { %1027 = vsyncpa [#allocation5 + $0x1], 1 }

</bundles_post_ra>
